<compile_context>
chip_gen: v7x
topology: tpu7x:2x2x1
jax: 0.10.0
libtpu: 0.0.40
codegen_flags: <defaults>
</compile_context>

<pallas_src>
import functools

import jax
import jax.numpy as jnp
from jax import lax
from jax.experimental import pallas as pl
from jax.experimental.pallas import tpu as pltpu


def _vmem_capacity_bytes():
    try:
        cap = getattr(pltpu.get_tpu_info(), "vmem_capacity_bytes", None)
        if cap:
            return int(cap)
    except Exception:
        pass
    return 128 << 20  # v5e/v6e physical VMEM; v7x reports its own (64 MiB)


def _corr_penalty_kernel(n_ref, x_ref, o_ref, g_acc, s_acc, *,
                         block_n, d, slab, precision):
    k = pl.program_id(0)
    nk = pl.num_programs(0)

    @pl.when(k == 0)
    def _init():
        g_acc[...] = jnp.zeros_like(g_acc)
        s_acc[...] = jnp.zeros_like(s_acc)

    n = n_ref[0]
    valid = n - k * block_n          # rows of this tile that hold real data

    def _accumulate(x):
        # G += x^T x : contract the batch axis directly on the MXU.
        g_acc[...] += lax.dot_general(
            x, x,
            dimension_numbers=(((0,), (0,)), ((), ())),
            preferred_element_type=jnp.float32,
            precision=precision,
        )
        # Column sums accumulated in f32 without materializing an f32 tile copy.
        s_acc[...] += jnp.sum(x, axis=0, dtype=jnp.float32, keepdims=True)

    @pl.when(valid >= block_n)
    def _full_tile():
        _accumulate(x_ref[...])

    @pl.when(valid < block_n)
    def _tail_tile():
        # Ragged last tile (no wrapper-side pad): rows >= valid are unspecified,
        # so zero them — zero rows are exactly neutral for G and s.
        x = x_ref[...]
        rows = lax.broadcasted_iota(jnp.int32, (block_n, d), 0)
        _accumulate(jnp.where(rows < valid, x, jnp.zeros_like(x)))

    @pl.when(k == nk - 1)
    def _finalize():
        inv_n = jnp.float32(1.0) / n.astype(jnp.float32)
        s = s_acc[...]                                   # (1, D) f32
        total = jnp.float32(0.0)
        # Walk G in (slab, D) row slabs: never hold a full (D, D) outer/cor
        # pair, and mask the diagonal exactly (matches PyTorch; no
        # sum(cor^2) - sum(diag^2) cancellation).
        for r0 in range(0, d, slab):
            rl = min(slab, d - r0)
            g_blk = g_acc[r0:r0 + rl, :]                 # (rl, D)
            s_blk = s[:, r0:r0 + rl]                     # (1, rl)
            # Rank-1 outer product as a K=1 matmul (no lane->sublane relayout).
            outer = lax.dot_general(
                s_blk, s,
                dimension_numbers=(((0,), (0,)), ((), ())),
                preferred_element_type=jnp.float32,
                precision=lax.Precision.HIGHEST,
            )                                            # (rl, D)
            cor = g_blk - outer * inv_n                  # centered Gram slab
            r_ids = lax.broadcasted_iota(jnp.int32, (rl, d), 0) + r0
            c_ids = lax.broadcasted_iota(jnp.int32, (rl, d), 1)
            cor = jnp.where(r_ids == c_ids, jnp.float32(0.0), cor)
            total = total + jnp.sum(cor * cor)
        o_ref[0, 0] = jnp.sqrt(total) * inv_n            # sqrt(sum offdiag^2)/N


def correlation_penalty_loss(x, *, block_n=None, buffer_count=2):
    """x: (N, D) array. Returns scalar float32 loss (matches the PyTorch module)."""
    n, d = x.shape
    itemsize = jnp.dtype(x.dtype).itemsize
    sublane = {4: 8, 2: 16, 1: 32}.get(itemsize, 8)      # dtype-correct packing

    vmem_budget = int(_vmem_capacity_bytes() * 0.75)     # headroom for compiler scratch

    gram_bytes = 4 * d * d                               # f32 Gram accumulator
    slab = min(d, 512)                                   # finalize row-slab height
    finalize_bytes = 3 * slab * d * 4                    # cor/outer/mask transients
    fixed_bytes = gram_bytes + 4 * d + finalize_bytes + (2 << 20)

    if fixed_bytes > vmem_budget:
        # TODO(synk): D-tiled Pallas path for very large D; plain JAX for now.
        xf = x.astype(jnp.float32)
        z = xf - jnp.mean(xf, axis=0, keepdims=True)
        cor = jnp.matmul(z.T, z, precision=lax.Precision.HIGHEST)
        off = cor - jnp.diag(jnp.diag(cor))
        return jnp.sqrt(jnp.sum(off * off)) / n

    bytes_per_row = d * itemsize
    nbuf = max(2, int(buffer_count))
    max_rows_by_vmem = max(sublane, (vmem_budget - fixed_bytes) // (nbuf * bytes_per_row))
    if block_n is None:
        # ~2 MiB input tiles keep the streamed DMA near HBM roofline even for
        # narrow D (bytes-based sizing instead of a fixed row cap).
        block_n = max(sublane, (2 << 20) // bytes_per_row)
    block_n = min(int(block_n), int(max_rows_by_vmem))
    if block_n >= n:
        block_n = n                                      # full-dim block is always legal
    else:
        block_n = max(sublane, (block_n // sublane) * sublane)
    grid_k = int(pl.cdiv(n, block_n))

    # Conscious MXU pass-count choice (v5e review item): accurate f32 passes
    # for f32 inputs, single native pass otherwise.
    precision = (lax.Precision.HIGHEST if x.dtype == jnp.float32
                 else lax.Precision.DEFAULT)

    vmem_limit = int(min(vmem_budget,
                         max(fixed_bytes + nbuf * block_n * bytes_per_row + (2 << 20),
                             16 << 20)))

    x_spec_kwargs = {}
    if nbuf != 2:
        # Optional deeper buffering sweep knob for the narrow-D, HBM-bound case.
        x_spec_kwargs["pipeline_mode"] = pl.Buffered(nbuf)

    kernel = functools.partial(_corr_penalty_kernel,
                               block_n=block_n, d=d, slab=slab, precision=precision)

    n_smem = jnp.array([n], dtype=jnp.int32)             # true batch size (SMEM scalar)

    out = pl.pallas_call(
        kernel,
        out_shape=jax.ShapeDtypeStruct((1, 1), jnp.float32),
        grid=(grid_k,),
        in_specs=[
            pl.BlockSpec(memory_space=pltpu.MemorySpace.SMEM),               # n
            pl.BlockSpec((block_n, d), lambda k: (k, 0), **x_spec_kwargs),   # x tiles
        ],
        out_specs=pl.BlockSpec(memory_space=pltpu.MemorySpace.SMEM),
        scratch_shapes=[
            pltpu.VMEM((d, d), jnp.float32),   # G = sum_k x_k^T x_k
            pltpu.VMEM((1, d), jnp.float32),   # s = column sums
        ],
        compiler_params=pltpu.CompilerParams(
            dimension_semantics=("arbitrary",),          # batch axis is a reduction
            vmem_limit_bytes=vmem_limit,
        ),
        cost_estimate=pl.CostEstimate(
            flops=2 * n * d * d + 3 * d * d,
            transcendentals=0,
            bytes_accessed=int(n * d * itemsize + 8),
        ),
    )(n_smem, x)
    return out[0, 0]


def _reference(x):
    x = x.astype(jnp.float32)
    z = x - jnp.mean(x, axis=0, keepdims=True)
    cor = jnp.matmul(z.T, z, precision=lax.Precision.HIGHEST)
    off = cor - jnp.diag(jnp.diag(cor))
    return jnp.sqrt(jnp.sum(off * off)) / x.shape[0]


if __name__ == "__main__":
    key = jax.random.PRNGKey(0)
    N, D = 20, 32                      # N deliberately NOT a multiple of the tile
    x = jax.random.normal(key, (N, D), dtype=jnp.float32)

    # block_n=8 -> 3 reduction grid steps with a ragged 4-row tail tile:
    # exercises accumulator init/finalize and the in-kernel tail mask.
    loss = correlation_penalty_loss(x, block_n=8)
    jax.block_until_ready(loss)
    ref = _reference(x)
    assert jnp.allclose(loss, ref, rtol=2e-5, atol=1e-5), (loss, ref)

    # Default bytes-sized tiling (collapses to one full-batch block at this N).
    loss2 = correlation_penalty_loss(x)
    jax.block_until_ready(loss2)
    assert jnp.allclose(loss2, ref, rtol=2e-5, atol=1e-5), (loss2, ref)

    print("KERNEL_OK")
</pallas_src>

<mosaic_0001>
module attributes {stable_mosaic.version = 11 : i64} {
  func.func @_corr_penalty_kernel(%arg0: i32, %arg1: memref<1xi32, #tpu.memory_space<smem>>, %arg2: memref<8x32xf32, #tpu.memory_space<vmem>>, %arg3: memref<1x1xf32, #tpu.memory_space<smem>>, %arg4: memref<32x32xf32, #tpu.memory_space<vmem>>, %arg5: memref<1x32xf32, #tpu.memory_space<vmem>>) attributes {dimension_semantics = [#tpu.dimension_semantics<arbitrary>], iteration_bounds = array<i64: 3>, scalar_prefetch = 0 : i64, scratch_operands = 2 : i64, tpu.core_type = #tpu.core_type<tc>, window_params = [{transform_indices = @transform_0, window_bounds = array<i64: 1>}, {transform_indices = @transform_1, window_bounds = array<i64: 8, 32>}, {transform_indices = @transform_2, window_bounds = array<i64: 1, 1>}]} {
    %c0_i32 = arith.constant 0 : i32
    %0 = arith.cmpi eq, %arg0, %c0_i32 : i32
    %1 = arith.extui %0 : i1 to i32
    %c0_i32_0 = arith.constant 0 : i32
    %2 = arith.cmpi ne, %1, %c0_i32_0 : i32
    scf.if %2 {
      %cst = arith.constant 0.000000e+00 : f32
      %15 = vector.broadcast %cst : f32 to vector<32x32xf32>
      %c0_6 = arith.constant 0 : index
      %c0_7 = arith.constant 0 : index
      %16 = vector.load %arg4[%c0_6, %c0_7] : memref<32x32xf32, #tpu.memory_space<vmem>>, vector<32x32xf32>
      tpu.vector_store %arg4[%c0_6, %c0_7], %15 {strides = array<i32>} : memref<32x32xf32, #tpu.memory_space<vmem>>, vector<32x32xf32>,
      %cst_8 = arith.constant 0.000000e+00 : f32
      %17 = vector.broadcast %cst_8 : f32 to vector<1x32xf32>
      %c0_9 = arith.constant 0 : index
      %c0_10 = arith.constant 0 : index
      %18 = vector.load %arg5[%c0_9, %c0_10] : memref<1x32xf32, #tpu.memory_space<vmem>>, vector<1x32xf32>
      tpu.vector_store %arg5[%c0_9, %c0_10], %17 {strides = array<i32>} : memref<1x32xf32, #tpu.memory_space<vmem>>, vector<1x32xf32>,
    } else {
    }
    %c0 = arith.constant 0 : index
    %3 = memref.load %arg1[%c0] : memref<1xi32, #tpu.memory_space<smem>>
    %c8_i32 = arith.constant 8 : i32
    %4 = arith.muli %arg0, %c8_i32 : i32
    %5 = arith.subi %3, %4 : i32
    %c8_i32_1 = arith.constant 8 : i32
    %6 = arith.cmpi sge, %5, %c8_i32_1 : i32
    %7 = arith.extui %6 : i1 to i32
    %c0_i32_2 = arith.constant 0 : i32
    %8 = arith.cmpi ne, %7, %c0_i32_2 : i32
    scf.if %8 {
      %c0_6 = arith.constant 0 : index
      %c0_7 = arith.constant 0 : index
      %15 = vector.load %arg2[%c0_6, %c0_7] : memref<8x32xf32, #tpu.memory_space<vmem>>, vector<8x32xf32>
      %c0_8 = arith.constant 0 : index
      %c0_9 = arith.constant 0 : index
      %16 = vector.load %arg4[%c0_8, %c0_9] : memref<32x32xf32, #tpu.memory_space<vmem>>, vector<32x32xf32>
      %cst = arith.constant dense<0.000000e+00> : vector<32x32xf32>
      %17 = tpu.matmul %15, %15, %cst {dimension_numbers = #tpu.dot_dimension_numbers<[0], [0], [1], [1], [0, 1, 1, 1], [], []>, precision = #tpu.contract_precision<fp32>} : vector<8x32xf32>, vector<8x32xf32>, vector<32x32xf32> -> vector<32x32xf32>
      %18 = arith.addf %16, %17 : vector<32x32xf32>
      %c0_10 = arith.constant 0 : index
      %c0_11 = arith.constant 0 : index
      %19 = vector.load %arg4[%c0_10, %c0_11] : memref<32x32xf32, #tpu.memory_space<vmem>>, vector<32x32xf32>
      tpu.vector_store %arg4[%c0_10, %c0_11], %18 {strides = array<i32>} : memref<32x32xf32, #tpu.memory_space<vmem>>, vector<32x32xf32>,
      %c0_12 = arith.constant 0 : index
      %c0_13 = arith.constant 0 : index
      %20 = vector.load %arg5[%c0_12, %c0_13] : memref<1x32xf32, #tpu.memory_space<vmem>>, vector<1x32xf32>
      %cst_14 = arith.constant dense<0.000000e+00> : vector<32xf32>
      %21 = vector.multi_reduction <add>, %15, %cst_14 [0] : vector<8x32xf32> to vector<32xf32>
      %22 = vector.shape_cast %21 : vector<32xf32> to vector<1x32xf32>
      %23 = arith.addf %20, %22 : vector<1x32xf32>
      %c0_15 = arith.constant 0 : index
      %c0_16 = arith.constant 0 : index
      %24 = vector.load %arg5[%c0_15, %c0_16] : memref<1x32xf32, #tpu.memory_space<vmem>>, vector<1x32xf32>
      tpu.vector_store %arg5[%c0_15, %c0_16], %23 {strides = array<i32>} : memref<1x32xf32, #tpu.memory_space<vmem>>, vector<1x32xf32>,
    } else {
    }
    %c8_i32_3 = arith.constant 8 : i32
    %9 = arith.cmpi slt, %5, %c8_i32_3 : i32
    %10 = arith.extui %9 : i1 to i32
    %c0_i32_4 = arith.constant 0 : i32
    %11 = arith.cmpi ne, %10, %c0_i32_4 : i32
    scf.if %11 {
      %c0_6 = arith.constant 0 : index
      %c0_7 = arith.constant 0 : index
      %15 = vector.load %arg2[%c0_6, %c0_7] : memref<8x32xf32, #tpu.memory_space<vmem>>, vector<8x32xf32>
      %16 = tpu.iota {dimensions = array<i32: 0>} : vector<8x32xi32>
      %17 = vector.broadcast %5 : i32 to vector<8x32xi32>
      %18 = arith.cmpi slt, %16, %17 : vector<8x32xi32>
      %cst = arith.constant 0.000000e+00 : f32
      %19 = vector.broadcast %cst : f32 to vector<8x32xf32>
      %20 = arith.select %18, %15, %19 : vector<8x32xi1>, vector<8x32xf32>
      %c0_8 = arith.constant 0 : index
      %c0_9 = arith.constant 0 : index
      %21 = vector.load %arg4[%c0_8, %c0_9] : memref<32x32xf32, #tpu.memory_space<vmem>>, vector<32x32xf32>
      %cst_10 = arith.constant dense<0.000000e+00> : vector<32x32xf32>
      %22 = tpu.matmul %20, %20, %cst_10 {dimension_numbers = #tpu.dot_dimension_numbers<[0], [0], [1], [1], [0, 1, 1, 1], [], []>, precision = #tpu.contract_precision<fp32>} : vector<8x32xf32>, vector<8x32xf32>, vector<32x32xf32> -> vector<32x32xf32>
      %23 = arith.addf %21, %22 : vector<32x32xf32>
      %c0_11 = arith.constant 0 : index
      %c0_12 = arith.constant 0 : index
      %24 = vector.load %arg4[%c0_11, %c0_12] : memref<32x32xf32, #tpu.memory_space<vmem>>, vector<32x32xf32>
      tpu.vector_store %arg4[%c0_11, %c0_12], %23 {strides = array<i32>} : memref<32x32xf32, #tpu.memory_space<vmem>>, vector<32x32xf32>,
      %c0_13 = arith.constant 0 : index
      %c0_14 = arith.constant 0 : index
      %25 = vector.load %arg5[%c0_13, %c0_14] : memref<1x32xf32, #tpu.memory_space<vmem>>, vector<1x32xf32>
      %cst_15 = arith.constant dense<0.000000e+00> : vector<32xf32>
      %26 = vector.multi_reduction <add>, %20, %cst_15 [0] : vector<8x32xf32> to vector<32xf32>
      %27 = vector.shape_cast %26 : vector<32xf32> to vector<1x32xf32>
      %28 = arith.addf %25, %27 : vector<1x32xf32>
      %c0_16 = arith.constant 0 : index
      %c0_17 = arith.constant 0 : index
      %29 = vector.load %arg5[%c0_16, %c0_17] : memref<1x32xf32, #tpu.memory_space<vmem>>, vector<1x32xf32>
      tpu.vector_store %arg5[%c0_16, %c0_17], %28 {strides = array<i32>} : memref<1x32xf32, #tpu.memory_space<vmem>>, vector<1x32xf32>,
    } else {
    }
    %c2_i32 = arith.constant 2 : i32
    %12 = arith.cmpi eq, %arg0, %c2_i32 : i32
    %13 = arith.extui %12 : i1 to i32
    %c0_i32_5 = arith.constant 0 : i32
    %14 = arith.cmpi ne, %13, %c0_i32_5 : i32
    scf.if %14 {
      %15 = arith.sitofp %3 : i32 to f32
      %cst = arith.constant 1.000000e+00 : f32
      %16 = arith.divf %cst, %15 : f32
      %c0_6 = arith.constant 0 : index
      %c0_7 = arith.constant 0 : index
      %17 = vector.load %arg5[%c0_6, %c0_7] : memref<1x32xf32, #tpu.memory_space<vmem>>, vector<1x32xf32>
      %c0_8 = arith.constant 0 : index
      %c0_9 = arith.constant 0 : index
      %18 = vector.load %arg4[%c0_8, %c0_9] : memref<32x32xf32, #tpu.memory_space<vmem>>, vector<32x32xf32>
      %cst_10 = arith.constant dense<0.000000e+00> : vector<32x32xf32>
      %19 = tpu.matmul %17, %17, %cst_10 {dimension_numbers = #tpu.dot_dimension_numbers<[0], [0], [1], [1], [0, 1, 1, 1], [], []>, precision = #tpu.contract_precision<fp32>} : vector<1x32xf32>, vector<1x32xf32>, vector<32x32xf32> -> vector<32x32xf32>
      %20 = vector.broadcast %16 : f32 to vector<32x32xf32>
      %21 = arith.mulf %19, %20 : vector<32x32xf32>
      %22 = arith.subf %18, %21 : vector<32x32xf32>
      %23 = tpu.iota {dimensions = array<i32: 0>} : vector<32x32xi32>
      %c0_i32_11 = arith.constant 0 : i32
      %24 = vector.broadcast %c0_i32_11 : i32 to vector<32x32xi32>
      %25 = arith.addi %23, %24 : vector<32x32xi32>
      %26 = tpu.iota {dimensions = array<i32: 1>} : vector<32x32xi32>
      %27 = arith.cmpi eq, %25, %26 : vector<32x32xi32>
      %cst_12 = arith.constant 0.000000e+00 : f32
      %28 = vector.broadcast %cst_12 : f32 to vector<32x32xf32>
      %29 = arith.select %27, %28, %22 : vector<32x32xi1>, vector<32x32xf32>
      %30 = arith.mulf %29, %29 : vector<32x32xf32>
      %31 = vector.shape_cast %30 : vector<32x32xf32> to vector<1x32x32xf32>
      %cst_13 = arith.constant dense<0.000000e+00> : vector<1xf32>
      %32 = vector.multi_reduction <add>, %31, %cst_13 [1, 2] : vector<1x32x32xf32> to vector<1xf32>
      %33 = vector.shape_cast %32 : vector<1xf32> to vector<1x1x1xf32>
      %34 = vector.extract %33[0, 0, 0] : f32 from vector<1x1x1xf32>
      %cst_14 = arith.constant 0.000000e+00 : f32
      %35 = arith.addf %cst_14, %34 : f32
      %36 = math.sqrt %35 : f32
      %37 = arith.mulf %36, %16 : f32
      %c0_15 = arith.constant 0 : index
      %c0_16 = arith.constant 0 : index
      %38 = memref.load %arg3[%c0_15, %c0_16] : memref<1x1xf32, #tpu.memory_space<smem>>
      memref.store %37, %arg3[%c0_15, %c0_16] : memref<1x1xf32, #tpu.memory_space<smem>>
    } else {
    }
    return
  }
  func.func @transform_0(%arg0: i32) -> i32 {
    %c0_i32 = arith.constant 0 : i32
    %c0_i32_0 = arith.constant 0 : i32
    return %c0_i32 : i32
  }
  func.func @transform_1(%arg0: i32) -> (i32, i32) {
    %c0_i32 = arith.constant 0 : i32
    %c0_i32_0 = arith.constant 0 : i32
    return %arg0, %c0_i32 : i32, i32
  }
  func.func @transform_2(%arg0: i32) -> (i32, i32) {
    %c0_i32 = arith.constant 0 : i32
    %c0_i32_0 = arith.constant 0 : i32
    %c0_i32_1 = arith.constant 0 : i32
    return %c0_i32, %c0_i32_0 : i32, i32
  }
}

</mosaic_0001>

<bundles_post_ra>
// kernel: tpu_custom_call.1
= control target key start
LH: loop header
LB: loop body
LE: loop exit
PB: predicated region body
PF: predicated region fallthrough
CT: control target
= control target key end

     0   :  { %s2871_s0 = inlined_call_operand.<no memory space> [shape: s32[1], index: 0, kind: input, shape index: {}]   ;;  %s2872_s1 = inlined_call_operand.hbm [shape: f32[20,32], index: 1, kind: input, shape index: {}]   ;;  %s2873_s2 = inlined_call_operand.hbm [shape: f32[1,1], index: 2, kind: output, shape index: {}]  }
   0x1   :  { %7 = sst [smem:[#allocation4]] %s2871_s0 }
   0x2   :  { %8 = vsyncpa [#allocation6], 0 }
   0x3   :  { %10 = vsyncpa [#allocation6 + $0x1], 0 }
   0x4   :  { %11 = vsyncpa [#allocation7], 0  ;;  %s2689_s11 = smov 0   ;;  %s2691_s12 = smov 0  }
   0x5   :  { %s2693_s13 = smov 0   ;;  %s2695_s14 = smov 0  }
   0x6 LB: > { %s2708_s0 = sadd.s32 4294967295, %s2666_s14   ;;  %s2711_s15 = sadd.s32 1, %s2666_s14   ;;  %s2666_s14 = sphi %s2695_s14, %s2881_s14   ;;  %s2662_s13 = sphi %s2693_s13, %s2880_s13   ;;  %s2658_s12 = sphi %s2691_s12, %s2879_s12   ;;  %s2654_s11 = sphi %s2689_s11, %s2878_s11  }
   0x7   : > { %s42_s16 = ssub.s32 %s2666_s14, %s2711_s15  ;;  %s45_s17 = sadd.s32 1, %s2662_s13 }
   0x8   : > { %p43_p0 = scmp.eq.s32.totalorder %s42_s16, 0  ;;  %p52_p1 = scmp.ne.s32.totalorder %s2662_s13, %s2658_s12 }
   0x9   : > { %p53_p2 = scmp.eq.s32.totalorder %s2666_s14, 0  ;;  %p58_p3 = scmp.ne.s32.totalorder %s2658_s12, %s2654_s11 }
   0xa   : > { %s2721_s18 = scalar_select %p43_p0, %s2662_s13, %s45_s17  }
   0xb   : > { %p54_p4 = por %p53_p2, %p52_p1  ;;  %p59_p5 = scmp.eq.s32.totalorder %s2708_s0, 0 }
   0xc   : > { %p2542_p6 = scmp.lt.s32.totalorder %s2666_s14, 3  ;;  %s106_s20 = sand.u32 1, %s2662_s13  }
   0xd   : > { %p2725_p7 = por %p59_p5, %p58_p3  ;;  %s2219_s21 = sshll.u32 %s106_s20, 3 }
   0xe   : > { %s2220_s22 = sshll.u32 %s2666_s14, 7  ;;  %s110_s26 = scalar_lea.vmem [#allocation5], %s2219_s21 }
   0xf   : > { %s2734_s25 = scalar_lea.hbm %s2872_s1, %s2220_s22  ;;  %s117_s27 = sshll.u32 %s110_s26, 4  ;;  %s2736_s27 = int_to_ptr.vmem [resolvable:$true] %s117_s27 }
  0x10   : > { %p2738_p8 = pnand %p2542_p6, %p54_p4  ;;  %s107_s29 = scalar_lea.sflag [#allocation6], %s106_s20 }
  0x11   : > { %s2586_s30 = scalar_lea.hbm %s2734_s25, 128  ;;  %s2591_s5 = scalar_lea.hbm %s2872_s1, 384 }
  0x12   : > { %p2587_p11 = scmp.ne.s32.totalorder %s2734_s25, %s2586_s30  ;;  %p2588_p12 = pneg %p2738_p8 }
  0x13   : > { %p2592_p1 = scmp.lt.u32.totalorder %s2734_s25, %s2872_s1  ;;  %p2593_p2 = scmp.lt.u32.totalorder %s2591_s5, %s2586_s30 }
  0x14   : > { %p2589_p13 = pnand %p2588_p12, %p2587_p11  ;;  %p2595_p4 = scmp.lt.u32.totalorder %s2586_s30, %s2734_s25 }
  0x15   : > { %p2594_p3 = por %p2593_p2, %p2592_p1 }
  0x16   : > { %p2590_p0 = pneg %p2589_p13 }
  0x17   : > { %p2596_p5 = por %p2595_p4, %p2594_p3 }
  0x19   : > { %p2597_p6 = pnand %p2596_p5, %p2590_p0 }
  0x1b   : > { %2600 = shalt.err (!%p2597_p6)
}
  0x1c   : > { %s2601_s8 = scalar_lea.vmem %s2736_s27, 128  ;;  %s2668_s9 = smov [#allocation5]  }
  0x1d   : > { %p2602_p11 = scmp.ne.s32.totalorder %s2736_s27, %s2601_s8  ;;  %s2606_s10 = sshll.u32 %s2668_s9, 4  ;;  %s2607_s10 = int_to_ptr.vmem [resolvable:$false] %s2606_s10 }
  0x1e   : > { %s2608_s11 = scalar_lea.vmem %s2607_s10, 256  ;;  %p2609_p10 = scmp.lt.s32.totalorder %s2736_s27, %s2607_s10 }
  0x1f   : > { %p2604_p13 = pnand %p2602_p11, %p2588_p12  ;;  %p2610_p1 = scmp.lt.s32.totalorder %s2608_s11, %s2601_s8 }
  0x21   : > { %p2605_p9 = pneg %p2604_p13  ;;  %p2611_p2 = por %p2610_p1, %p2609_p10 }
  0x23   : > { %p2612_p3 = pnand %p2611_p2, %p2605_p9 }
  0x25   : > { %2615 = shalt.err (!%p2612_p3)
}
  0x26   : > { %2541 = dma.hbm_to_vmem [thread:$0]  (!%p2738_p8), %s2734_s25, 128, %s2736_s27, %s107_s29  }
  0x27   : > { %p2876_p0 = scmp.lt.s32.totalorder %s2666_s14, 4  ;;  %p2877_p4 = scmp.ge.s32.totalorder %s2666_s14, 1 }
  0x29   : > { %p123_p12 = pnand %p2877_p4, %p2876_p0 }
  0x2a   : > { %s128_s16 = sand.u32 (!%p123_p12), 1, %s2658_s12  }
  0x2b   : > { %126 = sbr.rel (%p123_p12) target bundleno = 1533 (0x5fd), region = 28  ;;  %s2774_s17 = sshll.u32 (!%p123_p12), %s128_s16, 3 }
  0x2c   : > { %s129_s20 = scalar_lea.sflag (!%p123_p12), [#allocation6], %s128_s16  ;;  %s132_s21 = scalar_lea.vmem (!%p123_p12), [#allocation5], %s2774_s17 }
  0x32   : > { %2645 = dma.done.wait (%p2725_p7), %s129_s20, 128  }
  0x33   : > { %2647 = vsyncadd (%p2725_p7), %s129_s20, 4294967168  ;;  %p2223_p9 = scmp.ne.s32.totalorder %s2708_s0, 0 }
  0x34   : > { %vm152_vm0 = vcmask (!%p2223_p9), 261120   ;;  %vm157_vm1 = vcmask (!%p2223_p9), 253952   ;;  %v2669_v0 = vmov (!%p2223_p9), 0.0  }
  0x35   : > { %151 = sbr.rel (%p2223_p9) target bundleno = 60 (0x3c), region = 36  ;;  %153 = vst.msk [vmem:[#allocation2] sm:$0xff] (!%p2223_p9), %vm152_vm0, %v2669_v0  ;;  %154 = vst.msk [vmem:[#allocation2 + $0x8] sm:$0xff] (!%p2223_p9), %vm152_vm0, %v2669_v0 }
  0x36   : > { %155 = vst.msk [vmem:[#allocation2 + $0x10] sm:$0xff] (!%p2223_p9), %vm152_vm0, %v2669_v0  ;;  %156 = vst.msk [vmem:[#allocation2 + $0x18] sm:$0xff] (!%p2223_p9), %vm152_vm0, %v2669_v0 }
  0x37   : > { %158 = vst.msk [vmem:[#allocation3] sm:$0x1] (!%p2223_p9), %vm157_vm1, %v2669_v0 }
  0x3c PF: > { %s2782_s14 = sld [smem:[#allocation4]]  ;;  %s2224_s22 = sshll.u32 %s2708_s0, 3 }
  0x42   : > { %s2786_s23 = ssub.s32 %s2782_s14, %s2224_s22 }
  0x43   : > { %p2225_p7 = scmp.lt.s32.totalorder %s2786_s23, 8 }
  0x44   : > { %v166_v1 = vld [vmem:[%s132_s21] sm:$0xff] (!%p2225_p7)  ;;  %vm795_vm2 = vcmask (!%p2225_p7), 261120   ;;  %v800_v9 = vld [vmem:[#allocation3] sm:$0x1] (!%p2225_p7)  ;;  %vm809_vm3 = vcmask (!%p2225_p7), 253952   ;;  %vm203_vm4 = vcmask (!%p2225_p7), 64512  }
  0x45   : > { %165 = sbr.rel (%p2225_p7) target bundleno = 455 (0x1c7), region = 40  ;;  %171 = vxpose.xlu0.b32.start.end [1/1] (short) (narrow) (!%p2225_p7), %v166_v1, 32  ;;  %v2791_v2 = vand.u32 (!%p2225_p7), 4294901760, %v166_v1  ;;  %v801_v3 = vsel (!%p2225_p7), %vm795_vm2, %v166_v1, 0.0  ;;  %v168_v46 = vld [vmem:[#allocation2 + $0x8] sm:$0xff] (!%p2225_p7)  ;;  %v167_v50 = vld [vmem:[#allocation2] sm:$0xff] (!%p2225_p7) }
  0x46   : > { %v802_v4 = vrot.slane (!%p2225_p7), %v801_v3, 4  ;;  %v170_v56 = vld [vmem:[#allocation2 + $0x18] sm:$0xff] (!%p2225_p7)  ;;  %v169_v59 = vld [vmem:[#allocation2 + $0x10] sm:$0xff] (!%p2225_p7) }
  0x47   : > { %2346 = vmatprep.subr.mxu0 (!%p2225_p7), %v2791_v2  ;;  %2322 = vmatprep.subr.mxu1 (!%p2225_p7), %v2791_v2  ;;  %v324_v11 = vsub.f32 (!%p2225_p7), %v166_v1, %v2791_v2 }
  0x48   : > { %v803_v5 = vadd.f32 (!%p2225_p7), %v802_v4, %v801_v3  ;;  %2347 = vmatpush3.msra.mxu0 (!%p2225_p7), %v2791_v2  ;;  %2323 = vmatpush3.msra.mxu1 (!%p2225_p7), %v2791_v2 }
  0x49   : > { %v325_v13 = vand.u32 (!%p2225_p7), 4294901760, %v324_v11 }
  0x4a   : > { %v804_v6 = vrot.slane (!%p2225_p7), %v803_v5, 2 }
  0x4b   : > { %v326_v14 = vsub.f32 (!%p2225_p7), %v324_v11, %v325_v13  ;;  %2354 = vmatprep.subr.mxu0 (!%p2225_p7), %v325_v13 }
  0x4c   : > { %v805_v7 = vadd.f32 %v804_v6, %v803_v5 }
  0x4d   : > { %v327_v15 = vand.u32 4294901760, %v326_v14 }
  0x4e   : > { %v806_v8 = vrot.slane %v805_v7, 1 }
  0x4f   : > { %2330 = vmatprep.subr.mxu1 %v327_v15 }
  0x50   : > { %v807_v10 = vadd.f32 %v806_v8, %v805_v7 }
  0x52   : > { %v808_v12 = vadd.f32 %v807_v10, %v800_v9 }
  0x54   : > { %810 = vst.msk [vmem:[#allocation3] sm:$0x1] %vm809_vm3, %v808_v12 }
  0xc5   : > { %v187_v16 = vpop.trf.xlu0 }
  0xc6   : > { %v205_v17 = vsel %vm203_vm4, %v187_v16, 0 }
  0xc7   : > { %v282_v18 = vand.u32 4294901760, %v205_v17 }
  0xc9   : > { %v283_v19 = vsub.f32 %v205_v17, %v282_v18  ;;  %v188_v20 = vpop.trf.xlu0 }
  0xca   : > { %v208_v21 = vsel %vm203_vm4, %v188_v20, 0 }
  0xcb   : > { %v292_v22 = vand.u32 4294901760, %v208_v21  ;;  %v284_v23 = vand.u32 4294901760, %v283_v19 }
  0xcd   : > { %v293_v24 = vsub.f32 %v208_v21, %v292_v22  ;;  %2348 = vmatprep.mubr.f32.mxu0 %v284_v23  ;;  %v189_v25 = vpop.trf.xlu0  ;;  %v285_v26 = vsub.f32 %v283_v19, %v284_v23 }
  0xce   : > { %v211_v27 = vsel %vm203_vm4, %v189_v25, 0 }
  0xcf   : > { %v302_v28 = vand.u32 4294901760, %v211_v27  ;;  %v286_v29 = vand.u32 4294901760, %v285_v26  ;;  %v294_v30 = vand.u32 4294901760, %v293_v24 }
  0xd1   : > { %v303_v31 = vsub.f32 %v211_v27, %v302_v28  ;;  %2324 = vmatprep.mubr.f32.mxu1 %v286_v29  ;;  %v190_v32 = vpop.trf.xlu0  ;;  %2349 = vmatmul.mubr.f32.vlgmr.msra.gmra.mrb[0].mxu0 %v294_v30  ;;  %v295_v33 = vsub.f32 %v293_v24, %v294_v30 }
  0xd2   : > { %v214_v34 = vsel %vm203_vm4, %v190_v32, 0  ;;  %2355 = vmatpush3.msra.mxu0 %v325_v13 }
  0xd3   : > { %v312_v35 = vand.u32 4294901760, %v214_v34  ;;  %v296_v36 = vand.u32 4294901760, %v295_v33  ;;  %v304_v37 = vand.u32 4294901760, %v303_v31  ;;  %2362 = vmatprep.subr.mxu0 %v2791_v2 }
  0xd5   : > { %v313_v38 = vsub.f32 %v214_v34, %v312_v35  ;;  %2325 = vmatmul.mubr.f32.vlgmr.msra.gmra.mrb[0].mxu1 %v296_v36  ;;  %2351 = vmatprep.mubr.f32.mxu0 %v304_v37  ;;  %v305_v39 = vsub.f32 %v303_v31, %v304_v37 }
  0xd6   : > { %2331 = vmatpush3.msra.mxu1 %v327_v15 }
  0xd7   : > { %v306_v40 = vand.u32 4294901760, %v305_v39  ;;  %v314_v41 = vand.u32 4294901760, %v313_v38  ;;  %2338 = vmatprep.subr.mxu1 %v324_v11 }
  0xd9   : > { %2327 = vmatprep.mubr.f32.mxu1 %v306_v40  ;;  %2352 = vmatmul.mubr.f32.gmra.mrb[2].mxu0 %v314_v41  ;;  %v315_v42 = vsub.f32 %v313_v38, %v314_v41 }
  0xda   : > { %2356 = vmatprep.mubr.f32.mxu0 %v282_v18 }
  0xdb   : > { %v316_v43 = vand.u32 4294901760, %v315_v42 }
  0xdd   : > { %2328 = vmatmul.mubr.f32.gmra.mrb[2].mxu1 %v316_v43  ;;  %2357 = vmatmul.mubr.f32.vlgmr.msra.gmra.mrb[0].mxu0 %v292_v22 }
  0xde   : > { %2332 = vmatprep.mubr.f32.mxu1 %v282_v18  ;;  %2359 = vmatprep.mubr.f32.mxu0 %v302_v28 }
  0xdf   : > { %2363 = vmatpush3.msra.mxu0 %v2791_v2 }
  0xe1   : > { %2333 = vmatmul.mubr.f32.vlgmr.msra.gmra.mrb[0].mxu1 %v292_v22  ;;  %2360 = vmatmul.mubr.f32.gmra.mrb[2].mxu0 %v312_v35 }
  0xe2   : > { %2339 = vmatpush3.msra.mxu1 %v324_v11  ;;  %2335 = vmatprep.mubr.f32.mxu1 %v302_v28 }
  0xe3   : > { %2364 = vmatprep.mubr.f32.mxu0 %v282_v18 }
  0xe5   : > { %2336 = vmatmul.mubr.f32.gmra.mrb[2].mxu1 %v312_v35  ;;  %2365 = vmatmul.mubr.f32.vlgmr.msra.gmra.mrb[0].mxu0 %v292_v22 }
  0xe6   : > { %2340 = vmatprep.mubr.f32.mxu1 %v283_v19  ;;  %2367 = vmatprep.mubr.f32.mxu0 %v302_v28 }
  0xe9   : > { %2341 = vmatmul.mubr.f32.vlgmr.msra.gmra.mrb[0].mxu1 %v293_v24  ;;  %2368 = vmatmul.mubr.f32.gmra.mrb[2].mxu0 %v312_v35 }
  0xea   : > { %2343 = vmatprep.mubr.f32.mxu1 %v303_v31 }
  0xed   : > { %2344 = vmatmul.mubr.f32.gmra.mrb[2].mxu1 %v313_v38 }
 0x1b8   : > { %v2366_v44 = vpop.f32.mrb[0].mxu0 }
 0x1b9   : > { %v769_v45 = vpop.f32.mrb[1].mxu0 }
 0x1bc   : > { %v2342_v47 = vpop.f32.mrb[0].mxu1  ;;  %v2369_v48 = vpop.f32.mrb[2].mxu0 }
 0x1bd   : > { %v2466_v49 = vadd.f32 %v2366_v44, %v2342_v47  ;;  %v486_v51 = vpop.f32.mrb[1].mxu1  ;;  %v781_v52 = vpop.f32.mrb[3].mxu0 }
 0x1be   : > { %v2467_v53 = vadd.f32 %v769_v45, %v486_v51 }
 0x1bf   : > { %v792_v54 = vadd.f32 %v2466_v49, %v168_v46 }
 0x1c0   : > { %v791_v55 = vadd.f32 %v2467_v53, %v167_v50  ;;  %v2345_v57 = vpop.f32.mrb[2].mxu1 }
 0x1c1   : > { %797 = vst.msk [vmem:[#allocation2 + $0x8] sm:$0xff] %vm795_vm2, %v792_v54  ;;  %v2468_v58 = vadd.f32 %v2369_v48, %v2345_v57  ;;  %v500_v60 = vpop.f32.mrb[3].mxu1 }
 0x1c2   : > { %796 = vst.msk [vmem:[#allocation2] sm:$0xff] %vm795_vm2, %v791_v55  ;;  %v2469_v61 = vadd.f32 %v781_v52, %v500_v60 }
 0x1c3   : > { %v794_v62 = vadd.f32 %v2468_v58, %v170_v56 }
 0x1c4   : > { %v793_v63 = vadd.f32 %v2469_v61, %v169_v59 }
 0x1c5   : > { %799 = vst.msk [vmem:[#allocation2 + $0x18] sm:$0xff] %vm795_vm2, %v794_v62 }
 0x1c6   : > { %798 = vst.msk [vmem:[#allocation2 + $0x10] sm:$0xff] %vm795_vm2, %v793_v63 }
 0x1c7 PF: > { %p2226_p8 = scmp.ge.s32.totalorder %s2786_s23, 8 }
 0x1c8   : > { %v816_v0 = vlaneseq (!%p2226_p8)  ;;  %v818_v1 = vstv (!%p2226_p8), %s2786_s23  ;;  %v815_v2 = vld [vmem:[%s132_s21] sm:$0xff] (!%p2226_p8)  ;;  %vm1449_vm5 = vcmask (!%p2226_p8), 261120   ;;  %v1454_v12 = vld [vmem:[#allocation3] sm:$0x1] (!%p2226_p8)  ;;  %vm1463_vm7 = vcmask (!%p2226_p8), 253952  }
 0x1c9   : > { %814 = sbr.rel (%p2226_p8) target bundleno = 848 (0x350), region = 44  ;;  %vm857_vm8 = vcmask (!%p2226_p8), 64512   ;;  %v822_v49 = vld [vmem:[#allocation2 + $0x8] sm:$0xff] (!%p2226_p8)  ;;  %v821_v53 = vld [vmem:[#allocation2] sm:$0xff] (!%p2226_p8) }
 0x1ca   : > { %v817_v3 = vshrl.u32 (!%p2226_p8), %v816_v0, 7 }
 0x1cc   : > { %vm819_vm6 = vcmp.lt.s32.totalorder (!%p2226_p8), %v817_v3, %v818_v1  ;;  %v824_v59 = vld [vmem:[#allocation2 + $0x18] sm:$0xff] (!%p2226_p8) }
 0x1cd   : > { %v820_v4 = vsel (!%p2226_p8), %vm819_vm6, %v815_v2, 0.0  ;;  %v823_v62 = vld [vmem:[#allocation2 + $0x10] sm:$0xff] (!%p2226_p8) }
 0x1ce   : > { %825 = vxpose.xlu0.b32.start.end [1/1] (short) (narrow) (!%p2226_p8), %v820_v4, 32  ;;  %v2813_v5 = vand.u32 (!%p2226_p8), 4294901760, %v820_v4  ;;  %v1455_v6 = vsel (!%p2226_p8), %vm1449_vm5, %v820_v4, 0.0 }
 0x1cf   : > { %v1456_v7 = vrot.slane (!%p2226_p8), %v1455_v6, 4 }
 0x1d0   : > { %2394 = vmatprep.subr.mxu0 %v2813_v5  ;;  %2370 = vmatprep.subr.mxu1 %v2813_v5  ;;  %v978_v14 = vsub.f32 %v820_v4, %v2813_v5 }
 0x1d1   : > { %v1457_v8 = vadd.f32 %v1456_v7, %v1455_v6  ;;  %2395 = vmatpush3.msra.mxu0 %v2813_v5  ;;  %2371 = vmatpush3.msra.mxu1 %v2813_v5 }
 0x1d2   : > { %v979_v16 = vand.u32 4294901760, %v978_v14 }
 0x1d3   : > { %v1458_v9 = vrot.slane %v1457_v8, 2 }
 0x1d4   : > { %v980_v17 = vsub.f32 %v978_v14, %v979_v16  ;;  %2402 = vmatprep.subr.mxu0 %v979_v16 }
 0x1d5   : > { %v1459_v10 = vadd.f32 %v1458_v9, %v1457_v8 }
 0x1d6   : > { %v981_v18 = vand.u32 4294901760, %v980_v17 }
 0x1d7   : > { %v1460_v11 = vrot.slane %v1459_v10, 1 }
 0x1d8   : > { %2378 = vmatprep.subr.mxu1 %v981_v18 }
 0x1d9   : > { %v1461_v13 = vadd.f32 %v1460_v11, %v1459_v10 }
 0x1db   : > { %v1462_v15 = vadd.f32 %v1461_v13, %v1454_v12 }
 0x1dd   : > { %1464 = vst.msk [vmem:[#allocation3] sm:$0x1] %vm1463_vm7, %v1462_v15 }
 0x24e   : > { %v841_v19 = vpop.trf.xlu0 }
 0x24f   : > { %v859_v20 = vsel %vm857_vm8, %v841_v19, 0 }
 0x250   : > { %v936_v21 = vand.u32 4294901760, %v859_v20 }
 0x252   : > { %v937_v22 = vsub.f32 %v859_v20, %v936_v21  ;;  %v842_v23 = vpop.trf.xlu0 }
 0x253   : > { %v862_v24 = vsel %vm857_vm8, %v842_v23, 0 }
 0x254   : > { %v946_v25 = vand.u32 4294901760, %v862_v24  ;;  %v938_v26 = vand.u32 4294901760, %v937_v22 }
 0x256   : > { %v947_v27 = vsub.f32 %v862_v24, %v946_v25  ;;  %2396 = vmatprep.mubr.f32.mxu0 %v938_v26  ;;  %v843_v28 = vpop.trf.xlu0  ;;  %v939_v29 = vsub.f32 %v937_v22, %v938_v26 }
 0x257   : > { %v865_v30 = vsel %vm857_vm8, %v843_v28, 0 }
 0x258   : > { %v956_v31 = vand.u32 4294901760, %v865_v30  ;;  %v940_v32 = vand.u32 4294901760, %v939_v29  ;;  %v948_v33 = vand.u32 4294901760, %v947_v27 }
 0x25a   : > { %v957_v34 = vsub.f32 %v865_v30, %v956_v31  ;;  %2372 = vmatprep.mubr.f32.mxu1 %v940_v32  ;;  %v844_v35 = vpop.trf.xlu0  ;;  %2397 = vmatmul.mubr.f32.vlgmr.msra.gmra.mrb[0].mxu0 %v948_v33  ;;  %v949_v36 = vsub.f32 %v947_v27, %v948_v33 }
 0x25b   : > { %v868_v37 = vsel %vm857_vm8, %v844_v35, 0  ;;  %2403 = vmatpush3.msra.mxu0 %v979_v16 }
 0x25c   : > { %v966_v38 = vand.u32 4294901760, %v868_v37  ;;  %v950_v39 = vand.u32 4294901760, %v949_v36  ;;  %v958_v40 = vand.u32 4294901760, %v957_v34  ;;  %2410 = vmatprep.subr.mxu0 %v2813_v5 }
 0x25e   : > { %v967_v41 = vsub.f32 %v868_v37, %v966_v38  ;;  %2373 = vmatmul.mubr.f32.vlgmr.msra.gmra.mrb[0].mxu1 %v950_v39  ;;  %2399 = vmatprep.mubr.f32.mxu0 %v958_v40  ;;  %v959_v42 = vsub.f32 %v957_v34, %v958_v40 }
 0x25f   : > { %2379 = vmatpush3.msra.mxu1 %v981_v18 }
 0x260   : > { %v960_v43 = vand.u32 4294901760, %v959_v42  ;;  %v968_v44 = vand.u32 4294901760, %v967_v41  ;;  %2386 = vmatprep.subr.mxu1 %v978_v14 }
 0x262   : > { %2375 = vmatprep.mubr.f32.mxu1 %v960_v43  ;;  %2400 = vmatmul.mubr.f32.gmra.mrb[2].mxu0 %v968_v44  ;;  %v969_v45 = vsub.f32 %v967_v41, %v968_v44 }
 0x263   : > { %2404 = vmatprep.mubr.f32.mxu0 %v936_v21 }
 0x264   : > { %v970_v46 = vand.u32 4294901760, %v969_v45 }
 0x266   : > { %2376 = vmatmul.mubr.f32.gmra.mrb[2].mxu1 %v970_v46  ;;  %2405 = vmatmul.mubr.f32.vlgmr.msra.gmra.mrb[0].mxu0 %v946_v25 }
 0x267   : > { %2380 = vmatprep.mubr.f32.mxu1 %v936_v21  ;;  %2407 = vmatprep.mubr.f32.mxu0 %v956_v31 }
 0x268   : > { %2411 = vmatpush3.msra.mxu0 %v2813_v5 }
 0x26a   : > { %2381 = vmatmul.mubr.f32.vlgmr.msra.gmra.mrb[0].mxu1 %v946_v25  ;;  %2408 = vmatmul.mubr.f32.gmra.mrb[2].mxu0 %v966_v38 }
 0x26b   : > { %2387 = vmatpush3.msra.mxu1 %v978_v14  ;;  %2383 = vmatprep.mubr.f32.mxu1 %v956_v31 }
 0x26c   : > { %2412 = vmatprep.mubr.f32.mxu0 %v936_v21 }
 0x26e   : > { %2384 = vmatmul.mubr.f32.gmra.mrb[2].mxu1 %v966_v38  ;;  %2413 = vmatmul.mubr.f32.vlgmr.msra.gmra.mrb[0].mxu0 %v946_v25 }
 0x26f   : > { %2388 = vmatprep.mubr.f32.mxu1 %v937_v22  ;;  %2415 = vmatprep.mubr.f32.mxu0 %v956_v31 }
 0x272   : > { %2389 = vmatmul.mubr.f32.vlgmr.msra.gmra.mrb[0].mxu1 %v947_v27  ;;  %2416 = vmatmul.mubr.f32.gmra.mrb[2].mxu0 %v966_v38 }
 0x273   : > { %2391 = vmatprep.mubr.f32.mxu1 %v957_v34 }
 0x276   : > { %2392 = vmatmul.mubr.f32.gmra.mrb[2].mxu1 %v967_v41 }
 0x341   : > { %v2414_v47 = vpop.f32.mrb[0].mxu0 }
 0x342   : > { %v1423_v48 = vpop.f32.mrb[1].mxu0 }
 0x345   : > { %v2390_v50 = vpop.f32.mrb[0].mxu1  ;;  %v2417_v51 = vpop.f32.mrb[2].mxu0 }
 0x346   : > { %v2486_v52 = vadd.f32 %v2414_v47, %v2390_v50  ;;  %v1140_v54 = vpop.f32.mrb[1].mxu1  ;;  %v1435_v55 = vpop.f32.mrb[3].mxu0 }
 0x347   : > { %v2487_v56 = vadd.f32 %v1423_v48, %v1140_v54 }
 0x348   : > { %v1446_v57 = vadd.f32 %v2486_v52, %v822_v49 }
 0x349   : > { %v1445_v58 = vadd.f32 %v2487_v56, %v821_v53  ;;  %v2393_v60 = vpop.f32.mrb[2].mxu1 }
 0x34a   : > { %1451 = vst.msk [vmem:[#allocation2 + $0x8] sm:$0xff] %vm1449_vm5, %v1446_v57  ;;  %v2488_v61 = vadd.f32 %v2417_v51, %v2393_v60  ;;  %v1154_v63 = vpop.f32.mrb[3].mxu1 }
 0x34b   : > { %1450 = vst.msk [vmem:[#allocation2] sm:$0xff] %vm1449_vm5, %v1445_v58  ;;  %v2489_v0 = vadd.f32 %v1435_v55, %v1154_v63 }
 0x34c   : > { %v1448_v1 = vadd.f32 %v2488_v61, %v824_v59 }
 0x34d   : > { %v1447_v2 = vadd.f32 %v2489_v0, %v823_v62 }
 0x34e   : > { %1453 = vst.msk [vmem:[#allocation2 + $0x18] sm:$0xff] %vm1449_vm5, %v1448_v1 }
 0x34f   : > { %1452 = vst.msk [vmem:[#allocation2 + $0x10] sm:$0xff] %vm1449_vm5, %v1447_v2 }
 0x350 PF: > { %p2227_p10 = scmp.ne.s32.totalorder %s2708_s0, 2 }
 0x351   : > { %v1473_v3 = vld [vmem:[#allocation3] sm:$0x1] (!%p2227_p10)  ;;  %vm1523_vm9 = vcmask (!%p2227_p10), 1040384   ;;  %s1469_s19 = scvt.s32.f32 (!%p2227_p10), %s2782_s14  ;;  %vm1510_vm10 = vcmask (!%p2227_p10), 7168   ;;  %v2111_v40 = vlaneseq (!%p2227_p10)  ;;  %v1475_v52 = vld [vmem:[#allocation2 + $0x8] sm:$0xff] (!%p2227_p10)  ;;  %vm2130_vm13 = vcmask (!%p2227_p10), 261120  }
 0x352   : > { %1468 = sbr.rel (%p2227_p10) target bundleno = 1518 (0x5ee), region = 48  ;;  %1478 = vxpose.xlu0.b32.start.end [1/1] (short) (narrow) (!%p2227_p10), %v1473_v3, 32  ;;  %v1525_v4 = vsel (!%p2227_p10), %vm1523_vm9, %v1473_v3, 0  ;;  %v1474_v55 = vld [vmem:[#allocation2] sm:$0xff] (!%p2227_p10) }
 0x353   : > { %v1528_v5 = vand.u32 (!%p2227_p10), 4294901760, %v1525_v4  ;;  %v1470_v10 = vstv (!%p2227_p10), %s1469_s19  ;;  %v2112_v42 = vshrl.u32 (!%p2227_p10), %v2111_v40, 7  ;;  %v2117_v47 = vand.u32 (!%p2227_p10), 127, %v2111_v40 }
 0x354   : > { %2582 = vrcp.f32 (!%p2227_p10), %v1470_v10 }
 0x355   : > { %2442 = vmatprep.subr.mxu0 (!%p2227_p10), %v1528_v5  ;;  %2418 = vmatprep.subr.mxu1 (!%p2227_p10), %v1528_v5  ;;  %v1635_v6 = vsub.f32 (!%p2227_p10), %v1525_v4, %v1528_v5  ;;  %v2113_v48 = vadd.s32 (!%p2227_p10), 8, %v2112_v42  ;;  %v2115_v58 = vadd.s32 (!%p2227_p10), 24, %v2112_v42  ;;  %vm2118_vm12 = vcmp.eq.s32.totalorder (!%p2227_p10), %v2112_v42, %v2117_v47  ;;  %v1477_v0 = vld [vmem:[#allocation2 + $0x18] sm:$0xff] (!%p2227_p10) }
 0x356   : > { %2443 = vmatpush3.msra.mxu0 (!%p2227_p10), %v1528_v5  ;;  %2419 = vmatpush3.msra.mxu1 (!%p2227_p10), %v1528_v5  ;;  %v2114_v62 = vadd.s32 (!%p2227_p10), 16, %v2112_v42  ;;  %v1476_v3 = vld [vmem:[#allocation2 + $0x10] sm:$0xff] (!%p2227_p10) }
 0x357   : > { %v1636_v7 = vand.u32 (!%p2227_p10), 4294901760, %v1635_v6  ;;  %vm2119_vm11 = vcmp.eq.s32.totalorder (!%p2227_p10), %v2113_v48, %v2117_v47  ;;  %vm2121_vm14 = vcmp.eq.s32.totalorder (!%p2227_p10), %v2115_v58, %v2117_v47 }
 0x358   : > { %vm2120_vm15 = vcmp.eq.s32.totalorder (!%p2227_p10), %v2114_v62, %v2117_v47 }
 0x359   : > { %v1637_v8 = vsub.f32 %v1635_v6, %v1636_v7  ;;  %2450 = vmatprep.subr.mxu0 %v1636_v7 }
 0x35b   : > { %v1638_v9 = vand.u32 4294901760, %v1637_v8 }
 0x35d   : > { %2426 = vmatprep.subr.mxu1 %v1638_v9 }
 0x35e   : > { %v2583_v11 = vpop.eup %2582 }
 0x35f   : > { %2526 = vpush %v2583_v11 }
 0x390   : > { %s2837_s24 = spop %2526 }
 0x391   : > { %v2102_v46 = vstv %s2837_s24 }
 0x3d2   : > { %v1494_v12 = vpop.trf.xlu0 }
 0x3d3   : > { %v1512_v13 = vsel %vm1510_vm10, %v1494_v12, 0 }
 0x3d4   : > { %v1593_v14 = vand.u32 4294901760, %v1512_v13 }
 0x3d6   : > { %v1594_v15 = vsub.f32 %v1512_v13, %v1593_v14  ;;  %v1495_v16 = vpop.trf.xlu0 }
 0x3d7   : > { %v1515_v17 = vsel %vm1510_vm10, %v1495_v16, 0 }
 0x3d8   : > { %v1603_v18 = vand.u32 4294901760, %v1515_v17  ;;  %v1595_v19 = vand.u32 4294901760, %v1594_v15 }
 0x3da   : > { %v1604_v20 = vsub.f32 %v1515_v17, %v1603_v18  ;;  %2444 = vmatprep.mubr.f32.mxu0 %v1595_v19  ;;  %v1496_v21 = vpop.trf.xlu0  ;;  %v1596_v22 = vsub.f32 %v1594_v15, %v1595_v19 }
 0x3db   : > { %v1518_v23 = vsel %vm1510_vm10, %v1496_v21, 0 }
 0x3dc   : > { %v1613_v24 = vand.u32 4294901760, %v1518_v23  ;;  %v1597_v25 = vand.u32 4294901760, %v1596_v22  ;;  %v1605_v26 = vand.u32 4294901760, %v1604_v20 }
 0x3de   : > { %v1614_v27 = vsub.f32 %v1518_v23, %v1613_v24  ;;  %2420 = vmatprep.mubr.f32.mxu1 %v1597_v25  ;;  %v1497_v28 = vpop.trf.xlu0  ;;  %2445 = vmatmul.mubr.f32.vlgmr.msra.gmra.mrb[0].mxu0 %v1605_v26  ;;  %v1606_v29 = vsub.f32 %v1604_v20, %v1605_v26 }
 0x3df   : > { %v1521_v30 = vsel %vm1510_vm10, %v1497_v28, 0  ;;  %2451 = vmatpush3.msra.mxu0 %v1636_v7 }
 0x3e0   : > { %v1623_v31 = vand.u32 4294901760, %v1521_v30  ;;  %v1607_v32 = vand.u32 4294901760, %v1606_v29  ;;  %v1615_v33 = vand.u32 4294901760, %v1614_v27  ;;  %2458 = vmatprep.subr.mxu0 %v1528_v5 }
 0x3e2   : > { %v1624_v34 = vsub.f32 %v1521_v30, %v1623_v31  ;;  %2421 = vmatmul.mubr.f32.vlgmr.msra.gmra.mrb[0].mxu1 %v1607_v32  ;;  %2447 = vmatprep.mubr.f32.mxu0 %v1615_v33  ;;  %v1616_v35 = vsub.f32 %v1614_v27, %v1615_v33 }
 0x3e3   : > { %2427 = vmatpush3.msra.mxu1 %v1638_v9 }
 0x3e4   : > { %v1617_v36 = vand.u32 4294901760, %v1616_v35  ;;  %v1625_v37 = vand.u32 4294901760, %v1624_v34  ;;  %2434 = vmatprep.subr.mxu1 %v1635_v6 }
 0x3e6   : > { %2423 = vmatprep.mubr.f32.mxu1 %v1617_v36  ;;  %2448 = vmatmul.mubr.f32.gmra.mrb[2].mxu0 %v1625_v37  ;;  %v1626_v38 = vsub.f32 %v1624_v34, %v1625_v37 }
 0x3e7   : > { %2452 = vmatprep.mubr.f32.mxu0 %v1593_v14 }
 0x3e8   : > { %v1627_v39 = vand.u32 4294901760, %v1626_v38 }
 0x3ea   : > { %2424 = vmatmul.mubr.f32.gmra.mrb[2].mxu1 %v1627_v39  ;;  %2453 = vmatmul.mubr.f32.vlgmr.msra.gmra.mrb[0].mxu0 %v1603_v18 }
 0x3eb   : > { %2428 = vmatprep.mubr.f32.mxu1 %v1593_v14  ;;  %2455 = vmatprep.mubr.f32.mxu0 %v1613_v24 }
 0x3ec   : > { %2459 = vmatpush3.msra.mxu0 %v1528_v5 }
 0x3ee   : > { %2429 = vmatmul.mubr.f32.vlgmr.msra.gmra.mrb[0].mxu1 %v1603_v18  ;;  %2456 = vmatmul.mubr.f32.gmra.mrb[2].mxu0 %v1623_v31 }
 0x3ef   : > { %2435 = vmatpush3.msra.mxu1 %v1635_v6  ;;  %2431 = vmatprep.mubr.f32.mxu1 %v1613_v24 }
 0x3f0   : > { %2460 = vmatprep.mubr.f32.mxu0 %v1593_v14 }
 0x3f2   : > { %2432 = vmatmul.mubr.f32.gmra.mrb[2].mxu1 %v1623_v31  ;;  %2461 = vmatmul.mubr.f32.vlgmr.msra.gmra.mrb[0].mxu0 %v1603_v18 }
 0x3f3   : > { %2436 = vmatprep.mubr.f32.mxu1 %v1594_v15  ;;  %2463 = vmatprep.mubr.f32.mxu0 %v1613_v24 }
 0x3f6   : > { %2437 = vmatmul.mubr.f32.vlgmr.msra.gmra.mrb[0].mxu1 %v1604_v20  ;;  %2464 = vmatmul.mubr.f32.gmra.mrb[2].mxu0 %v1623_v31 }
 0x3f7   : > { %2439 = vmatprep.mubr.f32.mxu1 %v1614_v27 }
 0x3fa   : > { %2440 = vmatmul.mubr.f32.gmra.mrb[2].mxu1 %v1624_v34 }
 0x4c5   : > { %v2462_v41 = vpop.f32.mrb[0].mxu0 }
 0x4c6   : > { %v2080_v43 = vpop.f32.mrb[1].mxu0 }
 0x4c9   : > { %v2438_v44 = vpop.f32.mrb[0].mxu1  ;;  %v2465_v45 = vpop.f32.mrb[2].mxu0 }
 0x4ca   : > { %v2506_v49 = vadd.f32 %v2462_v41, %v2438_v44  ;;  %v1797_v50 = vpop.f32.mrb[1].mxu1  ;;  %v2092_v51 = vpop.f32.mrb[3].mxu0 }
 0x4cb   : > { %v2507_v53 = vadd.f32 %v2080_v43, %v1797_v50 }
 0x4cc   : > { %v2104_v54 = vmul.f32 %v2506_v49, %v2102_v46 }
 0x4cd   : > { %v2103_v56 = vmul.f32 %v2507_v53, %v2102_v46  ;;  %v2441_v57 = vpop.f32.mrb[2].mxu1 }
 0x4ce   : > { %v2108_v59 = vsub.f32 %v1475_v52, %v2104_v54  ;;  %v2508_v60 = vadd.f32 %v2465_v45, %v2441_v57  ;;  %v1811_v61 = vpop.f32.mrb[3].mxu1 }
 0x4cf   : > { %v2107_v63 = vsub.f32 %v1474_v55, %v2103_v56  ;;  %v2509_v1 = vadd.f32 %v2092_v51, %v1811_v61 }
 0x4d0   : > { %v2106_v2 = vmul.f32 %v2508_v60, %v2102_v46  ;;  %v2123_v4 = vsel %vm2119_vm11, 0.0, %v2108_v59 }
 0x4d1   : > { %v2122_v5 = vsel %vm2118_vm12, 0.0, %v2107_v63  ;;  %v2105_v6 = vmul.f32 %v2509_v1, %v2102_v46  ;;  %v2127_v7 = vmul.f32 %v2123_v4, %v2123_v4 }
 0x4d2   : > { %v2126_v8 = vmul.f32 %v2122_v5, %v2122_v5  ;;  %v2110_v9 = vsub.f32 %v1477_v0, %v2106_v2 }
 0x4d3   : > { %v2109_v10 = vsub.f32 %v1476_v3, %v2105_v6  ;;  %v2132_v11 = vsel %vm2130_vm13, %v2127_v7, 0.0 }
 0x4d4   : > { %v2125_v12 = vsel %vm2121_vm14, 0.0, %v2110_v9  ;;  %v2131_v13 = vsel %vm2130_vm13, %v2126_v8, 0.0 }
 0x4d5   : > { %v2124_v14 = vsel %vm2120_vm15, 0.0, %v2109_v10  ;;  %v2133_v15 = vadd.f32 %v2132_v11, %v2131_v13  ;;  %v2129_v17 = vmul.f32 %v2125_v12, %v2125_v12 }
 0x4d6   : > { %v2128_v16 = vmul.f32 %v2124_v14, %v2124_v14 }
 0x4d7   : > { %v2136_v20 = vsel %vm2130_vm13, %v2129_v17, 0.0 }
 0x4d8   : > { %v2134_v18 = vsel %vm2130_vm13, %v2128_v16, 0.0 }
 0x4d9   : > { %v2135_v19 = vadd.f32 %v2134_v18, %v2133_v15 }
 0x4db   : > { %v2137_v21 = vadd.f32 %v2136_v20, %v2135_v19 }
 0x4dd   : > { %2138 = vadd.xlane.f32.xlu0 %v2137_v21 }
 0x56a   : > { %v2139_v22 = vpop.xlane.xlu0 %2138 }
 0x56b   : > { %v2140_v23 = vrot.slane %v2139_v22, 4 }
 0x56d   : > { %v2141_v24 = vadd.f32 %v2140_v23, %v2139_v22 }
 0x56f   : > { %v2142_v25 = vrot.slane %v2141_v24, 2 }
 0x571   : > { %v2143_v26 = vadd.f32 %v2142_v25, %v2141_v24 }
 0x573   : > { %v2144_v27 = vrot.slane %v2143_v26, 1 }
 0x575   : > { %v2145_v28 = vadd.f32 %v2144_v27, %v2143_v26 }
 0x577   : > { %2528 = vpush %v2145_v28 }
 0x5a8   : > { %s2529_s25 = spop %2528 }
 0x5a9   : > { %v2148_v29 = vstv %s2529_s25 }
 0x5aa   : > { %2584 = vrsqrt.f32 %v2148_v29  ;;  %vm2151_vm0 = vcmp.eq.f32.partialorder %v2148_v29, inf  ;;  %v2154_v32 = vand.u32 2147483648, %v2148_v29  ;;  %vm2153_vm1 = vcmp.eq.f32.partialorder %v2148_v29, 0.0 }
 0x5b4   : > { %v2585_v30 = vpop.eup %2584 }
 0x5b5   : > { %v2150_v31 = vmul.f32 %v2585_v30, %v2148_v29 }
 0x5b7   : > { %v2152_v33 = vsel %vm2151_vm0, %v2148_v29, %v2150_v31 }
 0x5b8   : > { %v2155_v34 = vsel %vm2153_vm1, %v2154_v32, %v2152_v33 }
 0x5b9   : > { %2530 = vpush %v2155_v34 }
 0x5ea   : > { %s2531_s26 = spop %2530 }
 0x5eb   : > { %s2157_s27 = smul.f32 %s2531_s26, %s2837_s24 }
 0x5ed   : > { %2159 = sst [smem:[#allocation8]] %s2157_s27 }
 0x5ee PF: > { %p2543_p5 = scmp.eq.s32.totalorder %s2708_s0, 2  ;;  %s2616_s30 = scalar_lea.hbm %s2873_s2, 16 }
 0x5ef   : > { %p2617_p6 = scmp.ne.s32.totalorder %s2873_s2, %s2616_s30  ;;  %p2622_p1 = scmp.lt.u32.totalorder %s2616_s30, %s2873_s2 }
 0x5f1   : > { %p2618_p11 = pnand %p2617_p6, %p2543_p5 }
 0x5f3   : > { %p2619_p13 = pneg %p2618_p11 }
 0x5f5   : > { %p2624_p2 = pnand %p2622_p1, %p2619_p13 }
 0x5f7   : > { %2627 = shalt.err (!%p2624_p2)
}
 0x5f8   : > { %s2670_s7 = smov [#allocation8]  }
 0x5f9   : > { %2535 = dma.smem_to_hbm (%p2543_p5), %s2670_s7, 16, %s2873_s2, [#allocation7]  }
 0x5fa   : > { %2649 = dma.done.wait (%p2543_p5), [#allocation7], 16  }
 0x5fb   : > { %2651 = vsyncadd (%p2543_p5), [#allocation7], 4294967280 }
 0x5fc   : > { %2173 = sfence }
 0x5fd PF: > { %p14_p3 = scmp.ge.s32.totalorder %s2711_s15, 5   ;;  %s2878_s11 = smov %s2658_s12 }
 0x5fe   : > { %s2879_s12 = smov %s2662_s13  ;;  %s2880_s13 = smov %s2721_s18 }
 0x5ff   : > { %s2881_s14 = smov %s2711_s15  ;;  %16 = sbr.rel (!%p14_p3) target bundleno = 6 (0x6), region = 82 }
 0x606   :  { %2179 = vsyncpa [#allocation6], 1 }
 0x607   :  { %2181 = vsyncpa [#allocation6 + $0x1], 1 }
 0x608   :  { %2182 = vsyncpa [#allocation7], 1 }
 0x609   :  { %2184 = vsyncpa [#allocation7 + $0x1], 1 }

</bundles_post_ra>
